<compile_context>
chip_gen: v5e
topology: v5e:2x2
jax: 0.10.0
libtpu: 0.0.40
codegen_flags: <defaults>
</compile_context>

<pallas_src>
import functools

import jax
import jax.numpy as jnp
from jax.experimental import pallas as pl
from jax.experimental.pallas import tpu as pltpu


def _channel_attention_kernel(x_ref, w1t_ref, w2t_ref, o_ref, sum_sc, max_sc,
                              *, inv_hw, hw_total, thw, needs_mask):
    h = pl.program_id(1)
    last = pl.num_programs(1) - 1

    @pl.when(h == 0)
    def _init():
        sum_sc[...] = jnp.zeros_like(sum_sc)
        max_sc[...] = jnp.full_like(max_sc, -jnp.inf)

    def _accumulate(masked):
        x = x_ref[...]                                     # (TB, C, THW), input dtype
        if masked:
            lane = jax.lax.broadcasted_iota(jnp.int32, x.shape, x.ndim - 1)
            valid = hw_total - h * thw                     # lanes still in-bounds
            keep = lane < valid
            xs = jnp.where(keep, x, jnp.zeros((), x.dtype))
            xm = jnp.where(keep, x, jnp.full((), -jnp.inf, x.dtype))
        else:
            xs = xm = x
        # Cast fused into the reduce: f32 accumulation, no f32 copy of the tile.
        sum_sc[...] = sum_sc[...] + jnp.sum(xs, axis=-1, dtype=jnp.float32)
        # Max runs in the accumulator dtype (input dtype on bf16-capable VPUs).
        max_sc[...] = jnp.maximum(max_sc[...],
                                  jnp.max(xm, axis=-1).astype(max_sc.dtype))

    if needs_mask:
        @pl.when(h < last)
        def _steady():
            _accumulate(False)

        @pl.when(h == last)
        def _tail():
            _accumulate(True)
    else:
        _accumulate(False)

    @pl.when(h == last)
    def _finalize():
        tb = sum_sc.shape[0]
        avg = sum_sc[...] * inv_hw                         # exact mean (f32)
        mx = max_sc[...].astype(jnp.float32)
        pooled = jnp.concatenate([avg, mx], axis=0)        # (2*TB, C)
        hid = jnp.dot(pooled, w1t_ref[...],
                      preferred_element_type=jnp.float32)  # (2*TB, Cr)
        hid = jnp.maximum(hid, 0.0)                        # ReLU
        out = jnp.dot(hid, w2t_ref[...],
                      preferred_element_type=jnp.float32)  # (2*TB, C)
        out = out[:tb] + out[tb:]                          # avg branch + max branch
        o_ref[:, 0, :] = jax.nn.sigmoid(out).astype(o_ref.dtype)


def _device_kind():
    try:
        return jax.devices()[0].device_kind.lower()
    except Exception:
        return ""


def _vmem_budget():
    """Returns (vmem_limit_bytes, target bytes for one input block)."""
    cap = None
    try:
        cap = getattr(pltpu.get_tpu_info(), "vmem_capacity_bytes", None)
    except Exception:
        cap = None
    if not cap or cap <= 0:
        cap = 64 << 20                       # conservative fallback (v7x-sized VMEM)
    vmem_limit = int(cap * 3 // 4)           # 96 MiB on 128-MiB parts, 48 MiB on v7x
    target_block = vmem_limit // 3           # 2x double-buffered block + headroom
    return vmem_limit, target_block


def _pick_batch_tile(B, C, HW, itemsize, target_bytes, min_lanes=512):
    if B <= 1:
        return 1
    # >=2 blocks on the parallel axis whenever B >= 2 (v7x megacore sharding).
    cap = max(1, min(8, B // 2))
    tb = 1
    for t in range(cap, 0, -1):
        if B % t == 0:
            tb = t
            break
    # Don't let a huge TB*C slab force the spatial tile below ~min_lanes lanes
    # (short DMA row-runs waste HBM bandwidth): shrink TB instead.
    while tb > 1 and tb * C * itemsize * min(HW, min_lanes) > target_bytes:
        nt = tb // 2
        while nt > 1 and B % nt != 0:
            nt -= 1
        tb = max(nt, 1)
    return tb


def _pick_hw_tile(HW, TB, C, itemsize, target_bytes):
    """Spatial tile: full extent if it fits the budget, else the largest
    128-aligned size within budget.  Prefer an exact divisor of HW within ~25%
    of the budget; otherwise go ragged (last tile is lane-masked in-kernel)."""
    max_elems = max(1, target_bytes // max(1, TB * C * itemsize))
    if HW <= max_elems:
        return HW
    t = max((max_elems // 128) * 128, 128)
    lo = max(((t * 3 // 4) // 128) * 128, 128)
    d = t
    while d >= lo:
        if HW % d == 0:
            return d
        d -= 128
    return t


def channel_attention(x_nchw, w1, w2, *, target_block_bytes=None):
    """x_nchw: (B, C, H, W) (f32 or bf16); w1: (Cr, C) fc1 weight; w2: (C, Cr) fc2 weight.
    Returns sigmoid(fc2(relu(fc1(avgpool(x)))) + fc2(relu(fc1(maxpool(x))))), shape (B, C, 1, 1)."""
    B, C, H, W = x_nchw.shape
    Cr = w1.shape[0]
    HW = H * W

    x = x_nchw.reshape(B, C, HW)              # pure reshape: no HBM data movement
    w1t = jnp.asarray(w1, jnp.float32).T      # (C, Cr) -- tiny, resident in VMEM
    w2t = jnp.asarray(w2, jnp.float32).T      # (Cr, C)

    vmem_limit, target_bytes = _vmem_budget()
    if target_block_bytes is not None:        # test hook / manual override
        target_bytes = int(target_block_bytes)

    itemsize = x.dtype.itemsize
    TB = _pick_batch_tile(B, C, HW, itemsize, target_bytes)
    THW = _pick_hw_tile(HW, TB, C, itemsize, target_bytes)
    n_hw = pl.cdiv(HW, THW)
    needs_mask = (HW % THW) != 0

    # bf16 max accumulator only where the VPU has native bf16 (v6e / v7x).
    kind = _device_kind()
    old_vpu = any(v in kind for v in ("v2", "v3", "v4", "v5"))
    use_native_max = (x.dtype == jnp.dtype(jnp.bfloat16)) and not old_vpu
    max_dtype = x.dtype if use_native_max else jnp.float32

    kernel = functools.partial(
        _channel_attention_kernel,
        inv_hw=1.0 / HW, hw_total=HW, thw=THW, needs_mask=needs_mask)

    out = pl.pallas_call(
        kernel,
        out_shape=jax.ShapeDtypeStruct((B, 1, C), x_nchw.dtype),
        grid=(B // TB, n_hw),
        in_specs=[
            pl.BlockSpec((TB, C, THW), lambda b, h: (b, 0, h)),
            pl.BlockSpec((C, Cr), lambda b, h: (0, 0)),   # resident across the grid
            pl.BlockSpec((Cr, C), lambda b, h: (0, 0)),   # resident across the grid
        ],
        out_specs=pl.BlockSpec((TB, 1, C), lambda b, h: (b, 0, 0)),
        scratch_shapes=[
            pltpu.VMEM((TB, C), jnp.float32),   # running sum (always f32)
            pltpu.VMEM((TB, C), max_dtype),     # running max (input dtype on v6e/v7x bf16)
        ],
        compiler_params=pltpu.CompilerParams(
            dimension_semantics=("parallel", "arbitrary"),
            vmem_limit_bytes=vmem_limit),
    )(x, w1t, w2t)

    return out.reshape(B, C, 1, 1)


def reference(x_nchw, w1, w2):
    # Pure-JAX reference matching the PyTorch forward (computed in f32).
    xf = jnp.asarray(x_nchw, jnp.float32)
    avg = jnp.mean(xf, axis=(2, 3))                     # (B, C)
    mx = jnp.max(xf, axis=(2, 3))                       # (B, C)

    def mlp(v):
        h = jnp.maximum(v @ w1.T, 0.0)                  # (B, Cr)
        return h @ w2.T                                 # (B, C)

    out = jax.nn.sigmoid(mlp(avg) + mlp(mx))
    return out.reshape(*out.shape, 1, 1)


if __name__ == "__main__":
    B, C, H, W = 2, 16, 16, 16
    ratio = 8
    Cr = C // ratio

    key = jax.random.PRNGKey(0)
    kx, k1, k2 = jax.random.split(key, 3)

    x = jax.random.normal(kx, (B, C, H, W), dtype=jnp.float32)
    # Weights matching nn.Conv2d(C, Cr, 1, bias=False) / nn.Conv2d(Cr, C, 1, bias=False), squeezed.
    w1 = jax.random.normal(k1, (Cr, C), dtype=jnp.float32) * (1.0 / jnp.sqrt(C))
    w2 = jax.random.normal(k2, (C, Cr), dtype=jnp.float32) * (1.0 / jnp.sqrt(Cr))

    y = jax.block_until_ready(channel_attention(x, w1, w2))
    y_ref = reference(x, w1, w2)
    assert y.shape == (B, C, 1, 1)
    assert jnp.allclose(y, y_ref, atol=1e-5, rtol=1e-5)

    # bf16 streaming path (halves HBM bytes read); sum accumulation stays f32 in-kernel.
    y_bf16 = jax.block_until_ready(channel_attention(x.astype(jnp.bfloat16), w1, w2))
    assert jnp.allclose(y_bf16.astype(jnp.float32), y_ref, atol=5e-2, rtol=5e-2)

    # Ragged-HW path: force a tiny spatial tile so the last tile is lane-masked in-kernel.
    x2 = jax.random.normal(kx, (B, C, 20, 20), dtype=jnp.float32)   # HW=400, no 128-aligned divisor
    y2 = jax.block_until_ready(channel_attention(x2, w1, w2, target_block_bytes=8192))
    y2_ref = reference(x2, w1, w2)
    assert jnp.allclose(y2, y2_ref, atol=1e-5, rtol=1e-5)

    print("KERNEL_OK")
</pallas_src>

<mosaic_0001>
module attributes {stable_mosaic.version = 11 : i64} {
  func.func @_channel_attention_kernel(%arg0: i32, %arg1: i32, %arg2: memref<1x16x256xf32, #tpu.memory_space<vmem>>, %arg3: memref<16x2xf32, #tpu.memory_space<vmem>>, %arg4: memref<2x16xf32, #tpu.memory_space<vmem>>, %arg5: memref<1x1x16xf32, #tpu.memory_space<vmem>>, %arg6: memref<1x16xf32, #tpu.memory_space<vmem>>, %arg7: memref<1x16xf32, #tpu.memory_space<vmem>>) attributes {dimension_semantics = [#tpu.dimension_semantics<parallel>, #tpu.dimension_semantics<arbitrary>], iteration_bounds = array<i64: 2, 1>, scalar_prefetch = 0 : i64, scratch_operands = 2 : i64, tpu.core_type = #tpu.core_type<tc>, window_params = [{transform_indices = @transform_0, window_bounds = array<i64: 1, 16, 256>}, {pipeline_mode = #tpu.pipeline_mode<synchronous>, transform_indices = @transform_1, window_bounds = array<i64: 16, 2>}, {pipeline_mode = #tpu.pipeline_mode<synchronous>, transform_indices = @transform_2, window_bounds = array<i64: 2, 16>}, {transform_indices = @transform_3, window_bounds = array<i64: 1, 1, 16>}]} {
    %c0_i32 = arith.constant 0 : i32
    %0 = arith.cmpi eq, %arg1, %c0_i32 : i32
    %1 = arith.extui %0 : i1 to i32
    %c0_i32_0 = arith.constant 0 : i32
    %2 = arith.cmpi ne, %1, %c0_i32_0 : i32
    scf.if %2 {
      %cst_14 = arith.constant 0.000000e+00 : f32
      %15 = vector.broadcast %cst_14 : f32 to vector<1x16xf32>
      %c0_15 = arith.constant 0 : index
      %c0_16 = arith.constant 0 : index
      %16 = vector.load %arg6[%c0_15, %c0_16] : memref<1x16xf32, #tpu.memory_space<vmem>>, vector<1x16xf32>
      tpu.vector_store %arg6[%c0_15, %c0_16], %15 {strides = array<i32>} : memref<1x16xf32, #tpu.memory_space<vmem>>, vector<1x16xf32>,
      %cst_17 = arith.constant 0xFF800000 : f32
      %17 = vector.broadcast %cst_17 : f32 to vector<1x16xf32>
      %c0_18 = arith.constant 0 : index
      %c0_19 = arith.constant 0 : index
      %18 = vector.load %arg7[%c0_18, %c0_19] : memref<1x16xf32, #tpu.memory_space<vmem>>, vector<1x16xf32>
      tpu.vector_store %arg7[%c0_18, %c0_19], %17 {strides = array<i32>} : memref<1x16xf32, #tpu.memory_space<vmem>>, vector<1x16xf32>,
    } else {
    }
    %c0 = arith.constant 0 : index
    %c0_1 = arith.constant 0 : index
    %c0_2 = arith.constant 0 : index
    %3 = vector.load %arg2[%c0, %c0_1, %c0_2] : memref<1x16x256xf32, #tpu.memory_space<vmem>>, vector<1x16x256xf32>
    %c0_3 = arith.constant 0 : index
    %c0_4 = arith.constant 0 : index
    %4 = vector.load %arg6[%c0_3, %c0_4] : memref<1x16xf32, #tpu.memory_space<vmem>>, vector<1x16xf32>
    %cst = arith.constant dense<0.000000e+00> : vector<1x16xf32>
    %5 = vector.multi_reduction <add>, %3, %cst [2] : vector<1x16x256xf32> to vector<1x16xf32>
    %6 = arith.addf %4, %5 : vector<1x16xf32>
    %c0_5 = arith.constant 0 : index
    %c0_6 = arith.constant 0 : index
    %7 = vector.load %arg6[%c0_5, %c0_6] : memref<1x16xf32, #tpu.memory_space<vmem>>, vector<1x16xf32>
    tpu.vector_store %arg6[%c0_5, %c0_6], %6 {strides = array<i32>} : memref<1x16xf32, #tpu.memory_space<vmem>>, vector<1x16xf32>,
    %c0_7 = arith.constant 0 : index
    %c0_8 = arith.constant 0 : index
    %8 = vector.load %arg7[%c0_7, %c0_8] : memref<1x16xf32, #tpu.memory_space<vmem>>, vector<1x16xf32>
    %cst_9 = arith.constant dense<0xFF800000> : vector<1x16xf32>
    %9 = vector.multi_reduction <maximumf>, %3, %cst_9 [2] : vector<1x16x256xf32> to vector<1x16xf32>
    %10 = arith.maximumf %8, %9 : vector<1x16xf32>
    %c0_10 = arith.constant 0 : index
    %c0_11 = arith.constant 0 : index
    %11 = vector.load %arg7[%c0_10, %c0_11] : memref<1x16xf32, #tpu.memory_space<vmem>>, vector<1x16xf32>
    tpu.vector_store %arg7[%c0_10, %c0_11], %10 {strides = array<i32>} : memref<1x16xf32, #tpu.memory_space<vmem>>, vector<1x16xf32>,
    %c0_i32_12 = arith.constant 0 : i32
    %12 = arith.cmpi eq, %arg1, %c0_i32_12 : i32
    %13 = arith.extui %12 : i1 to i32
    %c0_i32_13 = arith.constant 0 : i32
    %14 = arith.cmpi ne, %13, %c0_i32_13 : i32
    scf.if %14 {
      %c0_14 = arith.constant 0 : index
      %c0_15 = arith.constant 0 : index
      %15 = vector.load %arg6[%c0_14, %c0_15] : memref<1x16xf32, #tpu.memory_space<vmem>>, vector<1x16xf32>
      %cst_16 = arith.constant 3.906250e-03 : f32
      %16 = vector.broadcast %cst_16 : f32 to vector<1x16xf32>
      %17 = arith.mulf %15, %16 : vector<1x16xf32>
      %c0_17 = arith.constant 0 : index
      %c0_18 = arith.constant 0 : index
      %18 = vector.load %arg7[%c0_17, %c0_18] : memref<1x16xf32, #tpu.memory_space<vmem>>, vector<1x16xf32>
      %19 = tpu.concatenate %17, %18 in 0 : vector<1x16xf32>, vector<1x16xf32> -> vector<2x16xf32>
      %c0_19 = arith.constant 0 : index
      %c0_20 = arith.constant 0 : index
      %20 = vector.load %arg3[%c0_19, %c0_20] : memref<16x2xf32, #tpu.memory_space<vmem>>, vector<16x2xf32>
      %cst_21 = arith.constant dense<0.000000e+00> : vector<2x2xf32>
      %21 = tpu.matmul %19, %20, %cst_21 {dimension_numbers = #tpu.dot_dimension_numbers<[1], [0], [0], [1], [0, 0, 1, 1], [], []>} : vector<2x16xf32>, vector<16x2xf32>, vector<2x2xf32> -> vector<2x2xf32>
      %cst_22 = arith.constant 0.000000e+00 : f32
      %22 = vector.broadcast %cst_22 : f32 to vector<2x2xf32>
      %23 = arith.maximumf %21, %22 : vector<2x2xf32>
      %c0_23 = arith.constant 0 : index
      %c0_24 = arith.constant 0 : index
      %24 = vector.load %arg4[%c0_23, %c0_24] : memref<2x16xf32, #tpu.memory_space<vmem>>, vector<2x16xf32>
      %cst_25 = arith.constant dense<0.000000e+00> : vector<2x16xf32>
      %25 = tpu.matmul %23, %24, %cst_25 {dimension_numbers = #tpu.dot_dimension_numbers<[1], [0], [0], [1], [0, 0, 1, 1], [], []>} : vector<2x2xf32>, vector<2x16xf32>, vector<2x16xf32> -> vector<2x16xf32>
      %26 = vector.extract_strided_slice %25 {offsets = [0, 0], sizes = [1, 16], strides = [1, 1]} : vector<2x16xf32> to vector<1x16xf32>
      %27 = vector.extract_strided_slice %25 {offsets = [1, 0], sizes = [1, 16], strides = [1, 1]} : vector<2x16xf32> to vector<1x16xf32>
      %28 = arith.addf %26, %27 : vector<1x16xf32>
      %29 = arith.negf %28 : vector<1x16xf32>
      %30 = math.exp %29 : vector<1x16xf32>
      %cst_26 = arith.constant 1.000000e+00 : f32
      %31 = vector.broadcast %cst_26 : f32 to vector<1x16xf32>
      %32 = arith.addf %31, %30 : vector<1x16xf32>
      %33 = arith.divf %31, %32 : vector<1x16xf32>
      %c0_27 = arith.constant 0 : index
      %c0_28 = arith.constant 0 : index
      %c0_29 = arith.constant 0 : index
      %34 = vector.load %arg5[%c0_27, %c0_28, %c0_29] : memref<1x1x16xf32, #tpu.memory_space<vmem>>, vector<1x1x16xf32>
      %35 = vector.shape_cast %34 : vector<1x1x16xf32> to vector<1x16xf32>
      %36 = vector.shape_cast %33 : vector<1x16xf32> to vector<1x1x16xf32>
      tpu.vector_store %arg5[%c0_27, %c0_28, %c0_29], %36 {strides = array<i32>} : memref<1x1x16xf32, #tpu.memory_space<vmem>>, vector<1x1x16xf32>,
    } else {
    }
    return
  }
  func.func @transform_0(%arg0: i32, %arg1: i32) -> (i32, i32, i32) {
    %c0_i32 = arith.constant 0 : i32
    %c0_i32_0 = arith.constant 0 : i32
    return %arg0, %c0_i32, %arg1 : i32, i32, i32
  }
  func.func @transform_1(%arg0: i32, %arg1: i32) -> (i32, i32) {
    %c0_i32 = arith.constant 0 : i32
    %c0_i32_0 = arith.constant 0 : i32
    %c0_i32_1 = arith.constant 0 : i32
    return %c0_i32, %c0_i32_0 : i32, i32
  }
  func.func @transform_2(%arg0: i32, %arg1: i32) -> (i32, i32) {
    %c0_i32 = arith.constant 0 : i32
    %c0_i32_0 = arith.constant 0 : i32
    %c0_i32_1 = arith.constant 0 : i32
    return %c0_i32, %c0_i32_0 : i32, i32
  }
  func.func @transform_3(%arg0: i32, %arg1: i32) -> (i32, i32, i32) {
    %c0_i32 = arith.constant 0 : i32
    %c0_i32_0 = arith.constant 0 : i32
    %c0_i32_1 = arith.constant 0 : i32
    return %arg0, %c0_i32, %c0_i32_0 : i32, i32, i32
  }
}

</mosaic_0001>

<bundles_post_ra>
// kernel: tpu_custom_call.1
= control target key start
LH: loop header
LB: loop body
LE: loop exit
PB: predicated region body
PF: predicated region fallthrough
CT: control target
= control target key end

     0   :  { %8 = vsyncpa [#allocation5], 0  ;;  %s895_s0 = inlined_call_operand.hbm [shape: f32[2,16,256], index: 0, kind: input, shape index: {}]   ;;  %s896_s1 = inlined_call_operand.vmem [shape: f32[16,2], index: 1, kind: input, shape index: {}]   ;;  %s897_s2 = inlined_call_operand.vmem [shape: f32[2,16], index: 2, kind: input, shape index: {}]   ;;  %s898_s3 = inlined_call_operand.hbm [shape: f32[2,1,16], index: 3, kind: output, shape index: {}]  }
   0x1   :  { %10 = vsyncpa [#allocation5 + $0x1], 0 }
   0x2   :  { %11 = vsyncpa [#allocation6], 0 }
   0x3   :  { %13 = vsyncpa [#allocation6 + $0x1], 0  ;;  %s758_s12 = smov 0   ;;  %s760_s13 = smov 0  }
   0x4   :  { %s762_s14 = smov 0   ;;  %s764_s15 = smov 0  }
   0x5   :  { %s766_s16 = smov 0   ;;  %s768_s17 = smov 0  }
   0x6 LB: > { %s528_s18 = sadd.s32 4294967295, %s731_s17   ;;  %s529_s19 = sadd.s32 4294967294, %s731_s17   ;;  %s731_s17 = sphi %s768_s17, %s19_s17   ;;  %s727_s16 = sphi %s766_s16, %s907_s16   ;;  %s723_s15 = sphi %s764_s15, %s906_s15   ;;  %s719_s14 = sphi %s762_s14, %s905_s14   ;;  %s715_s13 = sphi %s760_s13, %s904_s13   ;;  %s711_s12 = sphi %s758_s12, %s903_s12  }
   0x7   : > { %s31_s20 = sadd.s32 1, %s727_s16  ;;  %s40_s21 = sadd.s32 1, %s719_s14 }
   0x8   : > { %p33_p0 = scmp.ge.s32.totalorder %s31_s20, 2  ;;  %p47_p1 = scmp.ne.s32.totalorder %s719_s14, %s715_s13 }
   0x9   : > { %p48_p2 = scmp.eq.s32.totalorder %s731_s17, 0  ;;  %p53_p3 = scmp.ne.s32.totalorder %s715_s13, %s711_s12 }
   0xa   : > { %s909_s20 = smov (%p33_p0, %s31_s20), 0  ;;  %p54_p5 = scmp.eq.s32.totalorder %s528_s18, 0 }
   0xb   : > { %p799_p4 = por %p48_p2, %p47_p1  ;;  %s35_s23 = ssub.s32 %s727_s16, %s909_s20 }
   0xc   : > { %p119_p6 = scmp.eq.s32.totalorder %s528_s18, 1  ;;  %p38_p7 = scmp.eq.s32.totalorder %s35_s23, 0 }
   0xd   : > { %p805_p8 = por %p54_p5, %p53_p3  ;;  %p125_p10 = scmp.eq.s32.totalorder %s529_s19, 1 }
   0xe   : > { %p809_p9 = por %p119_p6, %p47_p1  ;;  %p531_p12 = scmp.ge.s32.totalorder %s731_s17, 2 }
   0xf   : > { %s814_s26 = scalar_select %p38_p7, %s719_s14, %s40_s21  }
  0x10   : > { %p816_p11 = por %p125_p10, %p53_p3  ;;  %p556_p13 = scmp.lt.s32.totalorder %s731_s17, 2 }
  0x11   : > { %s151_s28 = sand.u32 1, %s719_s14   ;;  %s543_s30 = sshll.u32 %s727_s16, 5 }
  0x12   : > { %s532_s29 = sshll.u32 %s151_s28, 5  ;;  %s162_s6 = scalar_lea.hbm %s895_s0, %s543_s30 }
  0x13   : > { %s155_s7 = scalar_lea.vmem [#allocation4], %s532_s29  ;;  %s163_s9 = sshll.u32 %s162_s6, 4  ;;  %s164_s9 = int_to_ptr.hbm [resolvable:$true] %s163_s9 }
  0x14   : > { %s165_s8 = sshll.u32 %s155_s7, 4  ;;  %p549_p0 = pnand %p556_p13, %p799_p4  ;;  %s166_s8 = int_to_ptr.vmem [resolvable:$true] %s165_s8 }
  0x15   : > { %p535_p1 = scmp.ge.s32.totalorder %s731_s17, 1  ;;  %s152_s10 = scalar_lea.sflag [#allocation5], %s151_s28 }
  0x16   : > { %s733_s11 = smov 256   ;;  %s734_s18 = smov 16  }
  0x17   : > { %551 = dma.hbm_to_vmem [thread:$0]  (!%p549_p0), %s164_s9, 512, %s166_s8, %s152_s10, %s733_s11, %s733_s11, %s734_s18  }
  0x18   : > { %p173_p2 = scmp.lt.s32.totalorder %s731_s17, 3 }
  0x1a   : > { %p174_p3 = pnand %p535_p1, %p173_p2 }
  0x1b   : > { %s832_s19 = sand.u32 (!%p174_p3), 1, %s715_s13  }
  0x1c   : > { %177 = sbr.rel (%p174_p3) target bundleno = 633 (0x279), region = 32  ;;  %s536_s21 = sshll.u32 (!%p174_p3), %s832_s19, 5 }
  0x1d   : > { %s180_s23 = scalar_lea.sflag (!%p174_p3), [#allocation5], %s832_s19  ;;  %s183_s29 = scalar_lea.vmem (!%p174_p3), [#allocation4], %s536_s21 }
  0x21   : > { %702 = dma.done.wait (%p805_p8), %s180_s23, 512  }
  0x22   : > { %704 = vsyncadd (%p805_p8), %s180_s23, 4294966784  ;;  %v214_v0 = vld [vmem:[%s183_s29] sm:$0xff]  ;;  %v215_v1 = vld [vmem:[%s183_s29 + $0x8] sm:$0xff]  ;;  %v735_v8 = vmov 0   ;;  %vm211_vm0 = vcmask 122880   ;;  %v736_v49 = vmov 0.0   ;;  %v274_v51 = vlaneseq  ;;  %s447_s8 = scalar_lea.hbm %s898_s3, %s723_s15 }
  0x23   : > { %v219_v2 = vadd.f32 %v215_v1, %v214_v0  ;;  %v286_v3 = vmax.f32 %v214_v0, %v215_v1  ;;  %v216_v4 = vld [vmem:[%s183_s29 + $0x10] sm:$0xff]  ;;  %v217_v5 = vld [vmem:[%s183_s29 + $0x18] sm:$0xff]  ;;  %611 = vset.pattern.permute.xlu2 %v735_v8  ;;  %612 = vset.pattern.permute.xlu0 %v735_v8  ;;  %212 = vst.msk [vmem:[#allocation2] sm:$0x1] %vm211_vm0, %v736_v49  ;;  %vm279_vm1 = vcmask 130112   ;;  %v737_v60 = vmov -inf  }
  0x24   : > { %v222_v6 = vadd.f32 %v217_v5, %v216_v4  ;;  %v289_v7 = vmax.f32 %v216_v4, %v217_v5  ;;  %613 = vset.pattern.permute.xlu1 %v735_v8  ;;  %v275_v52 = vand.u32 127, %v274_v51  ;;  %213 = vst.msk [vmem:[#allocation3] sm:$0x1] %vm211_vm0, %v737_v60  ;;  %v359_v61 = vld [vmem:[%s896_s1 + $0x8] sm:$0xff]  ;;  %v358_v62 = vld [vmem:[%s896_s1] sm:$0xff]  ;;  %vm356_vm2 = vcmask 1040384  }
  0x25   : > { %220 = vadd.xlane.f32.xlu0 %v219_v2  ;;  %287 = vmax.xlane.f32.xlu1 %v286_v3  ;;  %vm360_vm3 = vcmask 130048   ;;  %vm390_vm4 = vcmask 1041408   ;;  %vm386_vm5 = vcmask 15360   ;;  %s205_s9 = scalar_lea.vmem [#allocation7], %s832_s19  ;;  %s451_s11 = sshll.u32 %s447_s8, 4  ;;  %s452_s11 = int_to_ptr.hbm [resolvable:$true] %s451_s11 }
  0x26   : > { %v277_v53 = vadd.s32 4294967288, %v275_v52  ;;  %378 = vmatpush.msra.mxu0 %v359_v61  ;;  %s449_s10 = sshll.u32 %s205_s9, 4  ;;  %s439_s15 = scalar_lea.sflag [#allocation6], %s832_s19  ;;  %s450_s10 = int_to_ptr.vmem [resolvable:$true] %s449_s10 }
  0x27   : > { %s663_s18 = sshra.s32 %s452_s11, 4  ;;  %s669_s22 = scalar_lea.hbm %s898_s3, 2  ;;  %s664_s18 = int_to_ptr.hbm [resolvable:$true] %s663_s18 }
  0x28   : > { %379 = vmatpush.msra.mxu0 %v358_v62  ;;  %s665_s21 = scalar_lea.hbm %s664_s18, 1  ;;  %p670_p7 = scmp.lt.s32.totalorder %s664_s18, %s898_s3 }
  0x29   : > { %p666_p4 = scmp.ne.s32.totalorder %s664_s18, %s665_s21  ;;  %p671_p8 = scmp.lt.s32.totalorder %s669_s22, %s665_s21 }
  0x2a   : > { %v218_v56 = vld [vmem:[#allocation2] sm:$0x1] }
  0x2b   : > { %v285_v2 = vld [vmem:[#allocation3] sm:$0x1]  ;;  %p667_p5 = pnand %p666_p4, %p809_p9  ;;  %p672_p10 = por %p671_p8, %p670_p7 }
  0x2d   : > { %223 = vadd.xlane.f32.xlu0 %v222_v6  ;;  %290 = vmax.xlane.f32.xlu1 %v289_v7  ;;  %p668_p6 = pneg %p667_p5 }
  0x2f   : > { %p673_p13 = pnand %p672_p10, %p668_p6 }
  0x98   : > { %v221_v9 = vpop.xlane.xlu0 %220  ;;  %v288_v28 = vpop.xlane.xlu1 %287 }
  0x99   : > { %v227_v10 = vperm.slane %v221_v9, 0  ;;  %v228_v11 = vperm.slane %v221_v9, 1  ;;  %v229_v12 = vperm.slane %v221_v9, 2  ;;  %v230_v13 = vperm.slane %v221_v9, 3 }
  0x9a   : > { %v231_v14 = vperm.slane %v221_v9, 4  ;;  %v232_v15 = vperm.slane %v221_v9, 5  ;;  %v233_v16 = vperm.slane %v221_v9, 6  ;;  %v234_v17 = vperm.slane %v221_v9, 7 }
  0x9b   : > { %243 = vst [vmem:[#allocation1] ss:$9 sm:$0xff] %v227_v10  ;;  %v294_v29 = vperm.slane %v288_v28, 0  ;;  %v295_v30 = vperm.slane %v288_v28, 1  ;;  %v296_v31 = vperm.slane %v288_v28, 2  ;;  %v297_v33 = vperm.slane %v288_v28, 3 }
  0x9c   : > { %245 = vst [vmem:[#allocation1 + $0x1] ss:$9 sm:$0xff] %v228_v11  ;;  %v298_v34 = vperm.slane %v288_v28, 4  ;;  %v299_v35 = vperm.slane %v288_v28, 5  ;;  %v300_v36 = vperm.slane %v288_v28, 6  ;;  %v301_v37 = vperm.slane %v288_v28, 7 }
  0x9d   : > { %247 = vst [vmem:[#allocation1 + $0x2] ss:$9 sm:$0xff] %v229_v12  ;;  %v385_v10 = vld [vmem:[%s897_s2] sm:$0x3] }
  0x9e   : > { %249 = vst [vmem:[#allocation1 + $0x3] ss:$9 sm:$0xff] %v230_v13  ;;  %538 = vmatpush.msk.msra.mxu1 %vm390_vm4, %v385_v10 }
  0x9f   : > { %251 = vst [vmem:[#allocation1 + $0x4] ss:$9 sm:$0xff] %v231_v14 }
  0xa0   : > { %253 = vst [vmem:[#allocation1 + $0x5] ss:$9 sm:$0xff] %v232_v15  ;;  %v224_v18 = vpop.xlane.xlu0 %223  ;;  %v291_v38 = vpop.xlane.xlu1 %290 }
  0xa1   : > { %255 = vst [vmem:[#allocation1 + $0x6] ss:$9 sm:$0xff] %v233_v16  ;;  %v235_v19 = vperm.slane %v224_v18, 0  ;;  %v236_v20 = vperm.slane %v224_v18, 1  ;;  %v237_v21 = vperm.slane %v224_v18, 2  ;;  %v238_v23 = vperm.slane %v224_v18, 3 }
  0xa2   : > { %257 = vst [vmem:[#allocation1 + $0x7] ss:$9 sm:$0xff] %v234_v17  ;;  %v239_v24 = vperm.slane %v224_v18, 4  ;;  %v240_v25 = vperm.slane %v224_v18, 5  ;;  %v241_v26 = vperm.slane %v224_v18, 6  ;;  %v242_v27 = vperm.slane %v224_v18, 7 }
  0xa3   : > { %v302_v39 = vperm.slane %v291_v38, 0  ;;  %v303_v40 = vperm.slane %v291_v38, 1  ;;  %v304_v41 = vperm.slane %v291_v38, 2  ;;  %v305_v42 = vperm.slane %v291_v38, 3 }
  0xa4   : > { %v306_v44 = vperm.slane %v291_v38, 4  ;;  %v307_v45 = vperm.slane %v291_v38, 5  ;;  %v308_v46 = vperm.slane %v291_v38, 6  ;;  %v309_v47 = vperm.slane %v291_v38, 7 }
  0xa9   : > { %v258_v22 = vld [vmem:[#allocation1] sm:$0xff] }
  0xaa   : > { %259 = vst [vmem:[#allocation1] ss:$9 sm:$0xff] %v235_v19  ;;  %269 = vperm.xlu2 %611, %v258_v22  }
  0xab   : > { %260 = vst [vmem:[#allocation1 + $0x1] ss:$9 sm:$0xff] %v236_v20 }
  0xac   : > { %261 = vst [vmem:[#allocation1 + $0x2] ss:$9 sm:$0xff] %v237_v21 }
  0xad   : > { %262 = vst [vmem:[#allocation1 + $0x3] ss:$9 sm:$0xff] %v238_v23 }
  0xae   : > { %263 = vst [vmem:[#allocation1 + $0x4] ss:$9 sm:$0xff] %v239_v24 }
  0xaf   : > { %264 = vst [vmem:[#allocation1 + $0x5] ss:$9 sm:$0xff] %v240_v25 }
  0xb0   : > { %265 = vst [vmem:[#allocation1 + $0x6] ss:$9 sm:$0xff] %v241_v26 }
  0xb1   : > { %266 = vst [vmem:[#allocation1 + $0x7] ss:$9 sm:$0xff] %v242_v27 }
  0xb8   : > { %v267_v32 = vld [vmem:[#allocation1] sm:$0xff] }
  0xb9   : > { %310 = vst [vmem:[#allocation1] ss:$9 sm:$0xff] %v294_v29  ;;  %272 = vperm.xlu2 %611, %v267_v32  }
  0xba   : > { %312 = vst [vmem:[#allocation1 + $0x1] ss:$9 sm:$0xff] %v295_v30 }
  0xbb   : > { %314 = vst [vmem:[#allocation1 + $0x2] ss:$9 sm:$0xff] %v296_v31 }
  0xbc   : > { %316 = vst [vmem:[#allocation1 + $0x3] ss:$9 sm:$0xff] %v297_v33 }
  0xbd   : > { %318 = vst [vmem:[#allocation1 + $0x4] ss:$9 sm:$0xff] %v298_v34 }
  0xbe   : > { %320 = vst [vmem:[#allocation1 + $0x5] ss:$9 sm:$0xff] %v299_v35 }
  0xbf   : > { %322 = vst [vmem:[#allocation1 + $0x6] ss:$9 sm:$0xff] %v300_v36 }
  0xc0   : > { %324 = vst [vmem:[#allocation1 + $0x7] ss:$9 sm:$0xff] %v301_v37 }
  0xc7   : > { %v325_v43 = vld [vmem:[#allocation1] sm:$0xff] }
  0xc8   : > { %336 = vperm.xlu0 %612, %v325_v43   ;;  %326 = vst [vmem:[#allocation1] ss:$9 sm:$0xff] %v302_v39 }
  0xc9   : > { %327 = vst [vmem:[#allocation1 + $0x1] ss:$9 sm:$0xff] %v303_v40 }
  0xca   : > { %328 = vst [vmem:[#allocation1 + $0x2] ss:$9 sm:$0xff] %v304_v41 }
  0xcb   : > { %329 = vst [vmem:[#allocation1 + $0x3] ss:$9 sm:$0xff] %v305_v42 }
  0xcc   : > { %330 = vst [vmem:[#allocation1 + $0x4] ss:$9 sm:$0xff] %v306_v44 }
  0xcd   : > { %331 = vst [vmem:[#allocation1 + $0x5] ss:$9 sm:$0xff] %v307_v45 }
  0xce   : > { %332 = vst [vmem:[#allocation1 + $0x6] ss:$9 sm:$0xff] %v308_v46 }
  0xcf   : > { %333 = vst [vmem:[#allocation1 + $0x7] ss:$9 sm:$0xff] %v309_v47 }
  0xd6   : > { %v334_v48 = vld [vmem:[#allocation1] sm:$0xff] }
  0xd7   : > { %339 = vperm.xlu1 %613, %v334_v48  }
 0x104   : > { %v270_v50 = vpop.permute.xlu2 %269 }
 0x105   : > { %v276_v55 = vperm.slane %v270_v50, %v275_v52 }
 0x113   : > { %v273_v54 = vpop.permute.xlu2 %272 }
 0x114   : > { %v278_v57 = vperm.slane %v273_v54, %v277_v53 }
 0x116   : > { %v280_v58 = vsel %vm279_vm1, %v278_v57, %v276_v55 }
 0x117   : > { %v282_v59 = vadd.f32 %v280_v58, %v218_v56 }
 0x119   : > { %284 = vst.msk [vmem:[#allocation2] sm:$0x1] %vm211_vm0, %v282_v59 }
 0x120   : > { %v350_v6 = vld [vmem:[#allocation2] sm:$0x1] }
 0x121   : > { %v351_v7 = vmul.f32 0.00390625, %v350_v6 }
 0x13a   : > { %v337_v63 = vpop.permute.xlu0 %336 }
 0x13b   : > { %v341_v1 = vperm.slane %v337_v63, %v275_v52 }
 0x149   : > { %v340_v0 = vpop.permute.xlu1 %339 }
 0x14a   : > { %v342_v3 = vperm.slane %v340_v0, %v277_v53 }
 0x14c   : > { %v343_v4 = vsel %vm279_vm1, %v342_v3, %v341_v1 }
 0x14d   : > { %v345_v5 = vmax.f32 %v285_v2, %v343_v4 }
 0x14f   : > { %346 = vst.msk [vmem:[#allocation3] sm:$0x1] %vm211_vm0, %v345_v5 }
 0x156   : > { %v614_v8 = vld [vmem:[#allocation3] ss:$0 sm:$0xff] }
 0x157   : > { %v357_v9 = vsel %vm356_vm2, %v351_v7, %v614_v8 }
 0x158   : > { %537 = vmatmul.msk.f32.vlgmr.msra.gmra.mxu0 %vm360_vm3, %v357_v9 }
 0x1d5   : > { %v381_v11 = vpop.f32.mrf.mxu0 }
 0x1d6   : > { %v384_v12 = vmax.f32 %v381_v11, 0.0 }
 0x1d8   : > { %539 = vmatmul.msk.f32.vlgmr.msra.gmra.mxu1 %vm386_vm5, %v384_v12 }
 0x255   : > { %v411_v13 = vpop.f32.mrf.mxu1 }
 0x256   : > { %v415_v14 = vrot.slane %v411_v13, 1 }
 0x258   : > { %v417_v15 = vadd.f32 %v415_v14, %v411_v13 }
 0x25a   : > { %v540_v16 = vmul.f32 -1.442695, %v417_v15 }
 0x25c   : > { %615 = vpow2.f32 %v540_v16 }
 0x262   : > { %v616_v17 = vpop.eup %615 }
 0x263   : > { %v421_v18 = vadd.f32 1.0, %v616_v17 }
 0x265   : > { %617 = vrcp.f32 %v421_v18  ;;  %v433_v22 = vand.u32 2147483648, %v421_v18  ;;  %v431_v24 = vand.u32 2147483647, %v421_v18  ;;  %vm427_vm7 = vweird.f32 %v421_v18 }
 0x267   : > { %v434_v26 = vor.u32 1.1754944e-38, %v433_v22  ;;  %vm432_vm9 = vcmp.eq.f32.partialorder %v431_v24, 8.507059e+37 }
 0x26b   : > { %v618_v19 = vpop.eup %617 }
 0x26c   : > { %v423_v20 = vmul.f32 %v618_v19, %v421_v18  ;;  %vm428_vm6 = vweird.f32 %v618_v19 }
 0x26d   : > { %vm429_vm8 = vmor %vm427_vm7, %vm428_vm6 }
 0x26e   : > { %v424_v21 = vsub.f32 1.0, %v423_v20 }
 0x270   : > { %v425_v23 = vmul.f32 %v618_v19, %v424_v21 }
 0x272   : > { %v426_v25 = vadd.f32 %v618_v19, %v425_v23 }
 0x274   : > { %v430_v27 = vsel %vm429_vm8, %v618_v19, %v426_v25 }
 0x275   : > { %v435_v28 = vsel %vm432_vm9, %v434_v26, %v430_v27 }
 0x276   : > { %437 = vst.msk [vmem:[%s205_s9] sm:$0x1] %vm211_vm0, %v435_v28 }
 0x277   : > { %676 = shalt.err (!%p673_p13)
}
 0x278   : > { %546 = dma.vmem_to_hbm [thread:$0]  (%p809_p9), %s450_s10, 16, %s452_s11, %s439_s15  }
 0x279 PF: > { %s463_s19 = sand.u32 1, %s711_s12   ;;  %p553_p0 = pnand %p531_p12, %p816_p11 }
 0x27a   : > { %s464_s30 = scalar_lea.sflag [#allocation6], %s463_s19 }
 0x27b   : > { %p554_p1 = pneg %p553_p0 }
 0x27d   : > { %706 = dma.done.wait (%p554_p1), %s464_s30, 16  }
 0x27e   : > { %708 = vsyncadd (%p554_p1), %s464_s30, 4294967280  ;;  %s19_s17 = sadd.s32 1, %s731_s17   ;;  %s903_s12 = smov %s715_s13 }
 0x27f   : > { %p16_p2 = scmp.ge.s32.totalorder %s19_s17, 4   ;;  %s904_s13 = smov %s719_s14 }
 0x280   : > { %s905_s14 = smov %s814_s26  ;;  %s906_s15 = smov %s727_s16 }
 0x281   : > { %s907_s16 = smov %s909_s20  ;;  %18 = sbr.rel (!%p16_p2) target bundleno = 6 (0x6), region = 99 }
 0x286   :  { %469 = vsyncpa [#allocation5], 1 }
 0x287   :  { %471 = vsyncpa [#allocation5 + $0x1], 1 }
 0x288   :  { %472 = vsyncpa [#allocation6], 1 }
 0x289   :  { %474 = vsyncpa [#allocation6 + $0x1], 1 }

</bundles_post_ra>
